<compile_context>
chip_gen: v6e
topology: v6e:2x2x1
jax: 0.10.0
libtpu: 0.0.40
codegen_flags: <defaults>
</compile_context>

<pallas_src>
import jax
import jax.numpy as jnp
from jax.experimental import pallas as pl
from jax.experimental.pallas import tpu as pltpu


def _bilinear_kernel(anchor_t_ref, readout_t_ref, w_t_ref, b_ref, out_ref):
    # anchor_t_ref:  (D, TILE_N) VMEM   anchor^T tile   (nodes on lanes)
    # readout_t_ref: (D, TILE_N) VMEM   readout^T tile
    # w_t_ref:       (D, D)      VMEM   W^T (resident across grid steps)
    # b_ref:         (1, 1)      SMEM   scalar bias
    # out_ref:       (1, TILE_N) VMEM   lane-dense logits
    #
    # t[j, n] = sum_i W[i, j] * anchor[n, i]            -> MXU matmul
    t = jnp.dot(w_t_ref[...], anchor_t_ref[...], preferred_element_type=jnp.float32)
    # logits[0, n] = sum_j t[j, n] * readout[n, j]      -> VPU mul + sublane reduce (XLU)
    logits = jnp.sum(t * readout_t_ref[...].astype(jnp.float32), axis=0, keepdims=True)
    out_ref[...] = (logits + b_ref[0, 0]).astype(out_ref.dtype)


def discriminator_forward(readout_emb, anchor_emb, weight, bias, *, tile_n=1024):
    """Pallas forward. readout_emb/anchor_emb: (N, D); weight: (D, D); bias: scalar/(1,).

    Returns logits of shape (N, 1), matching torch nn.Bilinear(D, D, 1) applied as
    bilinear(anchor_emb, readout_emb). Output dtype follows the input dtype.
    """
    N, D = anchor_emb.shape
    assert readout_emb.shape == (N, D)
    assert weight.shape == (D, D)
    out_dtype = anchor_emb.dtype

    # Lane-align N (it becomes the last dim after the transpose) and pick a tile
    # that divides the padded extent. tile_n is a multiple of 128.
    lane = 128
    n_lane = pl.cdiv(N, lane) * lane
    tile_n = min(tile_n, n_lane)
    n_pad = pl.cdiv(n_lane, tile_n) * tile_n
    pad = n_pad - N

    # Layout plumbing in the wrapper (cheap XLA transposes/pads, not compute):
    #   (N, D) -> (D, n_pad): features on sublanes, nodes on lanes.
    anchor_t = jnp.pad(anchor_emb, ((0, pad), (0, 0))).T
    readout_t = jnp.pad(readout_emb, ((0, pad), (0, 0))).T
    # Pre-transpose W so the kernel's MXU LHS contracts over W's anchor (first) axis:
    #   (W^T @ anchor^T)[j, n] = sum_i W[i, j] * anchor[n, i]
    w_t = weight.T
    bias2d = jnp.asarray(bias, dtype=jnp.float32).reshape(1, 1)

    grid = (n_pad // tile_n,)
    out = pl.pallas_call(
        _bilinear_kernel,
        out_shape=jax.ShapeDtypeStruct((1, n_pad), out_dtype),
        grid=grid,
        in_specs=[
            pl.BlockSpec((D, tile_n), lambda i: (0, i)),            # anchor^T tile
            pl.BlockSpec((D, tile_n), lambda i: (0, i)),            # readout^T tile
            pl.BlockSpec((D, D), lambda i: (0, 0)),                 # W^T (resident)
            pl.BlockSpec((1, 1), lambda i: (0, 0),
                         memory_space=pltpu.MemorySpace.SMEM),      # bias scalar
        ],
        out_specs=pl.BlockSpec((1, tile_n), lambda i: (0, i)),      # lane-dense logits
        compiler_params=pltpu.CompilerParams(
            dimension_semantics=("parallel",)),
    )(anchor_t, readout_t, w_t, bias2d)

    # (1, n_pad) lane-dense slab -> (N, 1) logits (pad rows dropped).
    return out[0, :N].reshape(N, 1)


if __name__ == "__main__":
    key = jax.random.PRNGKey(0)
    k1, k2, k3 = jax.random.split(key, 3)

    N = 8           # number of nodes / subgraphs in the batch
    out_feats = 32  # hidden embedding dim

    readout_emb = jax.random.normal(k1, (N, out_feats), dtype=jnp.float32)
    anchor_emb = jax.random.normal(k2, (N, out_feats), dtype=jnp.float32)

    # Deterministic parameter init, matching the PyTorch module's __init__:
    #   constant_(weight, 0.5), constant_(bias, 0.0)
    weight = jnp.full((out_feats, out_feats), 0.5, dtype=jnp.float32)
    bias = jnp.zeros((1,), dtype=jnp.float32)

    logits = discriminator_forward(readout_emb, anchor_emb, weight, bias)
    logits = jax.block_until_ready(logits)

    # Pure-JAX reference check of bilinear semantics (module-init weights).
    ref = (anchor_emb @ weight * readout_emb).sum(-1, keepdims=True) + bias[0]
    assert logits.shape == (N, 1)
    assert jnp.allclose(logits, ref, atol=1e-4, rtol=1e-4)

    # Extra check with an asymmetric weight to guard the W^T orientation in the
    # transposed (D, N) formulation.
    w_rand = jax.random.normal(k3, (out_feats, out_feats), dtype=jnp.float32)
    b_rand = jnp.asarray([0.25], dtype=jnp.float32)
    logits2 = jax.block_until_ready(
        discriminator_forward(readout_emb, anchor_emb, w_rand, b_rand))
    ref2 = (anchor_emb @ w_rand * readout_emb).sum(-1, keepdims=True) + b_rand[0]
    assert jnp.allclose(logits2, ref2, atol=1e-4, rtol=1e-4)

    print("KERNEL_OK")
</pallas_src>

<mosaic_0001>
module attributes {stable_mosaic.version = 11 : i64} {
  func.func @_bilinear_kernel(%arg0: i32, %arg1: memref<32x128xf32, #tpu.memory_space<vmem>>, %arg2: memref<32x128xf32, #tpu.memory_space<vmem>>, %arg3: memref<32x32xf32, #tpu.memory_space<vmem>>, %arg4: memref<1x1xf32, #tpu.memory_space<smem>>, %arg5: memref<1x128xf32, #tpu.memory_space<vmem>>) attributes {dimension_semantics = [#tpu.dimension_semantics<parallel>], iteration_bounds = array<i64: 1>, scalar_prefetch = 0 : i64, scratch_operands = 0 : i64, tpu.core_type = #tpu.core_type<tc>, window_params = [{transform_indices = @transform_0, window_bounds = array<i64: 32, 128>}, {transform_indices = @transform_1, window_bounds = array<i64: 32, 128>}, {pipeline_mode = #tpu.pipeline_mode<synchronous>, transform_indices = @transform_2, window_bounds = array<i64: 32, 32>}, {transform_indices = @transform_3, window_bounds = array<i64: 1, 1>}, {transform_indices = @transform_4, window_bounds = array<i64: 1, 128>}]} {
    %c0 = arith.constant 0 : index
    %c0_0 = arith.constant 0 : index
    %0 = vector.load %arg3[%c0, %c0_0] : memref<32x32xf32, #tpu.memory_space<vmem>>, vector<32x32xf32>
    %c0_1 = arith.constant 0 : index
    %c0_2 = arith.constant 0 : index
    %1 = vector.load %arg1[%c0_1, %c0_2] : memref<32x128xf32, #tpu.memory_space<vmem>>, vector<32x128xf32>
    %cst = arith.constant dense<0.000000e+00> : vector<32x128xf32>
    %2 = tpu.matmul %0, %1, %cst {dimension_numbers = #tpu.dot_dimension_numbers<[1], [0], [0], [1], [0, 0, 1, 1], [], []>} : vector<32x32xf32>, vector<32x128xf32>, vector<32x128xf32> -> vector<32x128xf32>
    %c0_3 = arith.constant 0 : index
    %c0_4 = arith.constant 0 : index
    %3 = vector.load %arg2[%c0_3, %c0_4] : memref<32x128xf32, #tpu.memory_space<vmem>>, vector<32x128xf32>
    %4 = arith.mulf %2, %3 : vector<32x128xf32>
    %cst_5 = arith.constant dense<0.000000e+00> : vector<128xf32>
    %5 = vector.multi_reduction <add>, %4, %cst_5 [0] : vector<32x128xf32> to vector<128xf32>
    %6 = vector.shape_cast %5 : vector<128xf32> to vector<1x128xf32>
    %c0_6 = arith.constant 0 : index
    %c0_7 = arith.constant 0 : index
    %7 = memref.load %arg4[%c0_6, %c0_7] : memref<1x1xf32, #tpu.memory_space<smem>>
    %8 = vector.broadcast %7 : f32 to vector<1x128xf32>
    %9 = arith.addf %6, %8 : vector<1x128xf32>
    %c0_8 = arith.constant 0 : index
    %c0_9 = arith.constant 0 : index
    %10 = vector.load %arg5[%c0_8, %c0_9] : memref<1x128xf32, #tpu.memory_space<vmem>>, vector<1x128xf32>
    tpu.vector_store %arg5[%c0_8, %c0_9], %9 {strides = array<i32>} : memref<1x128xf32, #tpu.memory_space<vmem>>, vector<1x128xf32>,
    return
  }
  func.func @transform_0(%arg0: i32) -> (i32, i32) {
    %c0_i32 = arith.constant 0 : i32
    %c0_i32_0 = arith.constant 0 : i32
    return %c0_i32, %arg0 : i32, i32
  }
  func.func @transform_1(%arg0: i32) -> (i32, i32) {
    %c0_i32 = arith.constant 0 : i32
    %c0_i32_0 = arith.constant 0 : i32
    return %c0_i32, %arg0 : i32, i32
  }
  func.func @transform_2(%arg0: i32) -> (i32, i32) {
    %c0_i32 = arith.constant 0 : i32
    %c0_i32_0 = arith.constant 0 : i32
    %c0_i32_1 = arith.constant 0 : i32
    return %c0_i32, %c0_i32_0 : i32, i32
  }
  func.func @transform_3(%arg0: i32) -> (i32, i32) {
    %c0_i32 = arith.constant 0 : i32
    %c0_i32_0 = arith.constant 0 : i32
    %c0_i32_1 = arith.constant 0 : i32
    return %c0_i32, %c0_i32_0 : i32, i32
  }
  func.func @transform_4(%arg0: i32) -> (i32, i32) {
    %c0_i32 = arith.constant 0 : i32
    %c0_i32_0 = arith.constant 0 : i32
    return %c0_i32, %arg0 : i32, i32
  }
}

</mosaic_0001>

<bundles_post_ra>
// kernel: tpu_custom_call.1
= control target key start
LH: loop header
LB: loop body
LE: loop exit
PB: predicated region body
PF: predicated region fallthrough
CT: control target
= control target key end

     0   :  { %10 = vsyncpa [#allocation4], 0  ;;  %s375_s0 = inlined_call_operand.hbm [shape: f32[32,128], index: 0, kind: input, shape index: {}]   ;;  %s376_s1 = inlined_call_operand.hbm [shape: f32[32,128], index: 1, kind: input, shape index: {}]   ;;  %s377_s2 = inlined_call_operand.hbm [shape: f32[32,32], index: 2, kind: input, shape index: {}]   ;;  %s378_s3 = inlined_call_operand.<no memory space> [shape: f32[1,1], index: 3, kind: input, shape index: {}]   ;;  %s379_s4 = inlined_call_operand.hbm [shape: f32[1,128], index: 4, kind: output, shape index: {}]  }
   0x1   :  { %11 = vsyncpa [#allocation7], 0 }
   0x2   :  { %12 = vsyncpa [#allocation5], 0  ;;  %s329_s15 = smov [#allocation6]   ;;  %s330_s17 = smov [#allocation3]  }
   0x3   :  { %s30_s16 = sshll.u32 %s329_s15, 4  ;;  %s18_s18 = sshll.u32 %s330_s17, 4  ;;  %s31_s16 = int_to_ptr.vmem [resolvable:$true] %s30_s16  ;;  %s19_s18 = int_to_ptr.vmem [resolvable:$true] %s18_s18 }
   0x4   :  { %s251_s19 = scalar_lea.vmem %s31_s16, 512  ;;  %p256_p1 = scmp.lt.s32.totalorder %s31_s16, %s31_s16 }
   0x5   :  { %p252_p0 = scmp.ne.s32.totalorder %s31_s16, %s251_s19  ;;  %p257_p2 = scmp.lt.s32.totalorder %s251_s19, %s251_s19 }
   0x7   :  { %p258_p3 = por %p257_p2, %p256_p1 }
   0x9   :  { %p259_p4 = pnand %p258_p3, %p252_p0 }
   0xb   :  { %262 = shalt.err (!%p259_p4)
}
   0xc   :  { %s331_s20 = smov 128   ;;  %s332_s21 = smov 8  }
   0xd   :  { %36 = dma.hbm_to_vmem [thread:$0]  %s376_s1, 512, %s31_s16, [#allocation7], %s331_s20, %s331_s20, %s332_s21  }
   0xe   :  { %s271_s24 = scalar_lea.vmem %s19_s18, 512  ;;  %p276_p6 = scmp.lt.s32.totalorder %s19_s18, %s19_s18 }
   0xf   :  { %p272_p5 = scmp.ne.s32.totalorder %s19_s18, %s271_s24  ;;  %p277_p7 = scmp.lt.s32.totalorder %s271_s24, %s271_s24 }
  0x11   :  { %p278_p8 = por %p277_p7, %p276_p6 }
  0x13   :  { %p279_p9 = pnand %p278_p8, %p272_p5 }
  0x15   :  { %282 = shalt.err (!%p279_p9)
}
  0x16   :  { %24 = dma.hbm_to_vmem [thread:$0]  %s375_s0, 512, %s19_s18, [#allocation4], %s331_s20, %s331_s20, %s332_s21  }
  0x17   :  { %s333_s27 = smov [#allocation8]  }
  0x18   :  { %s42_s28 = sshll.u32 %s333_s27, 4  ;;  %s43_s28 = int_to_ptr.vmem [resolvable:$true] %s42_s28 }
  0x19   :  { %s291_s29 = scalar_lea.vmem %s43_s28, 512  ;;  %p296_p11 = scmp.lt.s32.totalorder %s43_s28, %s43_s28 }
  0x1a   :  { %p292_p10 = scmp.ne.s32.totalorder %s43_s28, %s291_s29  ;;  %p297_p12 = scmp.lt.s32.totalorder %s291_s29, %s291_s29 }
  0x1c   :  { %p298_p13 = por %p297_p12, %p296_p11 }
  0x1e   :  { %p299_p0 = pnand %p298_p13, %p292_p10 }
  0x20   :  { %302 = shalt.err (!%p299_p0)
}
  0x21   :  { %48 = dma.hbm_to_vmem [thread:$0]  %s377_s2, 512, %s43_s28, [#allocation7], %s331_s20, %s331_s20, %s332_s21  }
  0x22   :  { %323 = dma.done.wait [#allocation4], 512  }
  0x23   :  { %324 = vsyncadd [#allocation4], 4294966784 }
  0x24   :  { %325 = dma.done.wait [#allocation7], 1024  }
  0x25   :  { %326 = vsyncadd [#allocation7], 4294966272  ;;  %v67_v0 = vld [vmem:[#allocation3 + $0x18] sm:$0xff]  ;;  %v66_v1 = vld [vmem:[#allocation3 + $0x10] sm:$0xff]  ;;  %vm68_vm0 = vcmask 261120   ;;  %v184_v28 = vstv %s378_s3  ;;  %s334_s5 = smov [#allocation9]  }
  0x26   :  { %215 = vmatprep.subr.mxu0 %v67_v0  ;;  %229 = vmatprep.subr.mxu1 %v67_v0  ;;  %v65_v2 = vld [vmem:[#allocation3 + $0x8] sm:$0xff]  ;;  %v64_v3 = vld [vmem:[#allocation3] sm:$0xff]  ;;  %v62_v5 = vld [vmem:[#allocation8 + $0x10] sm:$0xff]  ;;  %s193_s6 = sshll.u32 %s334_s5, 4  ;;  %s194_s6 = int_to_ptr.vmem [resolvable:$true] %s193_s6 }
  0x27   :  { %216 = vmatpush3.msra.mxu0 %v67_v0  ;;  %233 = vmatpush3.msra.mxu1 %v67_v0  ;;  %v60_v4 = vld [vmem:[#allocation8] sm:$0xff]  ;;  %v61_v6 = vld [vmem:[#allocation8 + $0x8] sm:$0xff]  ;;  %v63_v7 = vld [vmem:[#allocation8 + $0x18] sm:$0xff]  ;;  %s303_s7 = scalar_lea.vmem %s194_s6, 16  ;;  %s307_s8 = scalar_lea.vmem %s194_s6, 32 }
  0x28   :  { %217 = vmatprep.subr.mxu0 %v66_v1  ;;  %230 = vmatprep.subr.mxu1 %v66_v1  ;;  %v167_v9 = vld [vmem:[#allocation6 + $0x8] sm:$0xff]  ;;  %v166_v11 = vld [vmem:[#allocation6] sm:$0xff]  ;;  %v168_v14 = vld [vmem:[#allocation6 + $0x10] sm:$0xff]  ;;  %p304_p1 = scmp.ne.s32.totalorder %s194_s6, %s303_s7  ;;  %p308_p2 = scmp.lt.s32.totalorder %s194_s6, %s194_s6 }
  0x29   :  { %218 = vmatpush3.msra.mxu0 %v66_v1  ;;  %234 = vmatpush3.msra.mxu1 %v66_v1  ;;  %v169_v17 = vld [vmem:[#allocation6 + $0x18] sm:$0xff]  ;;  %p309_p3 = scmp.lt.s32.totalorder %s307_s8, %s303_s7 }
  0x2a   :  { %219 = vmatprep.subr.mxu0 %v65_v2  ;;  %231 = vmatprep.subr.mxu1 %v65_v2 }
  0x2b   :  { %220 = vmatpush3.msra.mxu0 %v65_v2  ;;  %235 = vmatpush3.msra.mxu1 %v65_v2  ;;  %p310_p4 = por %p309_p3, %p308_p2 }
  0x2c   :  { %221 = vmatprep.subr.mxu0 %v64_v3  ;;  %232 = vmatprep.subr.mxu1 %v64_v3 }
  0x2d   :  { %222 = vmatpush3.msra.mxu0 %v64_v3  ;;  %236 = vmatpush3.msra.mxu1 %v64_v3  ;;  %p311_p5 = pnand %p310_p4, %p304_p1 }
  0x2e   :  { %223 = vmatprep.mubr.msk.f32.mxu0 %vm68_vm0, %v60_v4  ;;  %226 = vmatprep.mubr.msk.f32.mxu1 %vm68_vm0, %v62_v5 }
  0x2f   :  { %224 = vmatmul.mubr.msk.f32.vlgmr.msra.gmra.mxu0 %vm68_vm0, %v61_v6  ;;  %227 = vmatmul.mubr.msk.f32.vlgmr.msra.gmra.mxu1 %vm68_vm0, %v63_v7 }
  0xef   :  { %v225_v8 = vpop.f32.mrf.mxu0  ;;  %v228_v10 = vpop.f32.mrf.mxu1 }
  0xf0   :  { %v171_v15 = vmul.f32 %v225_v8, %v167_v9  ;;  %v173_v20 = vmul.f32 %v228_v10, %v169_v17 }
  0xf1   :  { %v147_v12 = vpop.f32.mrf.mxu0  ;;  %v157_v13 = vpop.f32.mrf.mxu1 }
  0xf2   :  { %v170_v16 = vmul.f32 %v166_v11, %v147_v12  ;;  %v172_v19 = vmul.f32 %v168_v14, %v157_v13 }
  0xf4   :  { %v174_v18 = vadd.f32 %v171_v15, %v170_v16 }
  0xf6   :  { %v175_v21 = vadd.f32 %v174_v18, %v172_v19 }
  0xf8   :  { %v176_v22 = vadd.f32 %v175_v21, %v173_v20 }
  0xfa   :  { %v177_v23 = vrot.slane %v176_v22, 4 }
  0xfc   :  { %v178_v24 = vadd.f32 %v177_v23, %v176_v22 }
  0xfe   :  { %v179_v25 = vrot.slane %v178_v24, 2 }
 0x100   :  { %v180_v26 = vadd.f32 %v179_v25, %v178_v24 }
 0x102   :  { %v181_v27 = vrot.slane %v180_v26, 1 }
 0x104   :  { %v182_v29 = vadd.f32 %v181_v27, %v180_v26 }
 0x106   :  { %v185_v30 = vadd.f32 %v184_v28, %v182_v29 }
 0x108   :  { %186 = vst [vmem:[#allocation9] sm:$0x1] %v185_v30 }
 0x109   :  { %314 = shalt.err (!%p311_p5)
}
 0x10a   :  { %196 = dma.vmem_to_hbm [thread:$0]  %s194_s6, 16, %s379_s4, [#allocation5]  }
 0x10b   :  { %327 = dma.done.wait [#allocation5], 16  }
 0x10c   :  { %328 = vsyncadd [#allocation5], 4294967280 }
 0x10d   :  { %200 = vsyncpa [#allocation4], 1 }
 0x10e   :  { %201 = vsyncpa [#allocation7], 1 }
 0x10f   :  { %202 = vsyncpa [#allocation5], 1 }

</bundles_post_ra>
